<compile_context>
chip_gen: v6e
topology: v6e:2x2x1
jax: 0.10.0
libtpu: 0.0.40
codegen_flags: <defaults>
</compile_context>

<pallas_src>
import math
import functools

import numpy as np
import jax
import jax.numpy as jnp
from jax import lax
from jax.experimental import pallas as pl
from jax.experimental.pallas import tpu as pltpu


# ----------------------------------------------------------------- linear ---
def _linear_kernel(x_ref, wt_ref, h_ref):
    h_ref[...] = jnp.dot(x_ref[...], wt_ref[...],
                         preferred_element_type=jnp.float32)


def _linear(x, wt):
    """h = x @ wt on the MXU (nn.Linear with bias=False, the module default)."""
    n = x.shape[0]
    f_out = wt.shape[1]
    # Small demo shapes: one full-array call.  For large N this would use the
    # standard tiled-matmul pattern (128-multiple M/N tiles, K-last grid).
    return pl.pallas_call(
        _linear_kernel,
        out_shape=jax.ShapeDtypeStruct((n, f_out), jnp.float32),
    )(x, wt)


# ---------------------------------------------------- median aggregation ----
def _median_agg_kernel(nbrs_ref, valid_ref, ksel_ref, h_ref, out_ref,
                       *, block_nodes, k_max):
    n, f_out = h_ref.shape
    b, k = block_nodes, k_max
    bk = b * k

    # ---- gather the whole block's neighbourhood with one MXU matmul -------
    idx = nbrs_ref[...]                                        # (B*K, 1) int32
    cols = lax.broadcasted_iota(jnp.int32, (bk, n), 1)
    onehot = (cols == idx).astype(jnp.float32)                 # (B*K, N)
    gathered = jnp.dot(onehot, h_ref[...],
                       preferred_element_type=jnp.float32)     # (B*K, F)

    # Trivial (tile-preserving) reshapes: last dim unchanged.
    vals = gathered.reshape(b, k, f_out)                       # (B, K, F)
    valid = valid_ref[...].reshape(b, k, 1) != 0               # (B, K, 1)
    ksel = ksel_ref[...].reshape(b, k, 1)                      # (B, K, 1)

    # ---- mask padded neighbour slots ---------------------------------------
    inf = jnp.float32(jnp.inf)
    vals = jnp.where(valid, vals, inf)

    # ---- exact torch.median (lower middle, element of the input) ----------
    # v is the ksel-th order statistic  iff  #{< v} <= ksel < #{<= v}.
    cl = jnp.zeros((b, k, f_out), jnp.int32)
    cle = jnp.zeros((b, k, f_out), jnp.int32)
    for m in range(k):                                         # static, K small
        vm = vals[:, m:m + 1, :]
        cl = cl + (vm < vals).astype(jnp.int32)
        cle = cle + (vm <= vals).astype(jnp.int32)
    is_kth = jnp.logical_and(cl <= ksel, cle > ksel)
    med = jnp.min(jnp.where(is_kth, vals, inf), axis=1)        # (B, F)

    out_ref[...] = med.astype(out_ref.dtype)                   # one dense store


def median_conv(x, weight, nbrs, deg, *, block_nodes=16):
    """out[i] = elementwise median over rows of (x @ weight.T)[nbrs[i, :deg[i]]]."""
    n, f_in = x.shape
    f_out = weight.shape[0]
    k_max = nbrs.shape[1]
    assert block_nodes % 8 == 0

    # 1) Linear projection (bias=False is the module default).
    # TODO(synk): bias=True would be a broadcast-add fused into _linear_kernel.
    h = _linear(x.astype(jnp.float32), weight.T.astype(jnp.float32))

    # 2) Sanitize the padded-neighbour representation (cheap XLA glue).
    deg = jnp.clip(deg.astype(jnp.int32), 1, k_max)
    nbrs = jnp.clip(nbrs.astype(jnp.int32), 0, n - 1)

    # Pad the node axis so the grid divides evenly (ragged tail support).
    n_pad = ((n + block_nodes - 1) // block_nodes) * block_nodes
    if n_pad != n:
        pad = n_pad - n
        nbrs = jnp.concatenate([nbrs, jnp.zeros((pad, k_max), jnp.int32)], 0)
        deg = jnp.concatenate([deg, jnp.ones((pad,), jnp.int32)], 0)

    # Flatten per-neighbour-slot metadata to (n_pad*k_max, 1).
    slot = jnp.arange(k_max, dtype=jnp.int32)[None, :]              # (1, K)
    valid = (slot < deg[:, None]).astype(jnp.int32)                 # (Np, K)
    ksel = ((deg - 1) // 2).astype(jnp.int32)                       # (Np,)
    nbrs_flat = nbrs.reshape(n_pad * k_max, 1)
    valid_flat = valid.reshape(n_pad * k_max, 1)
    ksel_flat = jnp.repeat(ksel, k_max).reshape(n_pad * k_max, 1)

    kernel = functools.partial(_median_agg_kernel,
                               block_nodes=block_nodes, k_max=k_max)
    bk = block_nodes * k_max
    grid_spec = pltpu.PrefetchScalarGridSpec(
        num_scalar_prefetch=0,
        grid=(n_pad // block_nodes,),
        in_specs=[
            pl.BlockSpec((bk, 1), lambda i: (i, 0)),        # nbrs (flat)
            pl.BlockSpec((bk, 1), lambda i: (i, 0)),        # valid (flat)
            pl.BlockSpec((bk, 1), lambda i: (i, 0)),        # ksel (flat)
            pl.BlockSpec((n, f_out), lambda i: (0, 0)),     # h, VMEM-resident
        ],
        out_specs=pl.BlockSpec((block_nodes, f_out), lambda i: (i, 0)),
    )
    # TODO(synk): for graphs where h (n*f_out*4 B) exceeds the per-generation
    # VMEM budget (esp. v7x 64 MiB), keep h in HBM (memory_space=pl.ANY) and
    # gather via double-buffered pltpu.make_async_copy instead.
    out = pl.pallas_call(
        kernel,
        out_shape=jax.ShapeDtypeStruct((n_pad, f_out), jnp.float32),
        grid_spec=grid_spec,
        compiler_params=pltpu.CompilerParams(
            # Node blocks are independent (no accumulator) -> parallel axis;
            # shards across both TensorCores on v7x, harmless on v5e/v6e.
            dimension_semantics=("parallel",)),
    )(nbrs_flat, valid_flat, ksel_flat, h)
    return out[:n]


# -------------------------------------------------------------- reference ---
def _reference(x, weight, nbrs, deg):
    """Pure numpy reference with torch.median (lower-middle) semantics."""
    h = np.asarray(x) @ np.asarray(weight).T
    nbrs = np.asarray(nbrs)
    deg = np.asarray(deg)
    outs = []
    for i in range(h.shape[0]):
        d = int(deg[i])
        vals = h[nbrs[i, :d]]
        s = np.sort(vals, axis=0)
        outs.append(s[(d - 1) // 2])
    return np.stack(outs)


if __name__ == "__main__":
    N, F_IN, F_OUT, K_MAX = 64, 32, 128, 8
    key = jax.random.PRNGKey(0)
    kx, kw, kn, kd = jax.random.split(key, 4)

    x = jax.random.normal(kx, (N, F_IN), dtype=jnp.float32)
    bound = 1.0 / math.sqrt(F_IN)                 # nn.Linear default init scale
    weight = jax.random.uniform(kw, (F_OUT, F_IN), dtype=jnp.float32,
                                minval=-bound, maxval=bound)
    nbrs = jax.random.randint(kn, (N, K_MAX), 0, N, dtype=jnp.int32)
    deg = jax.random.randint(kd, (N,), 1, K_MAX + 1, dtype=jnp.int32)

    out = jax.block_until_ready(median_conv(x, weight, nbrs, deg))
    ref = _reference(x, weight, nbrs, deg)

    assert out.shape == (N, F_OUT)
    err = float(np.max(np.abs(np.asarray(out) - ref)))
    assert np.allclose(np.asarray(out), ref, rtol=1e-3, atol=1e-3), err
    print("KERNEL_OK")
</pallas_src>

<mosaic_0001>
module attributes {stable_mosaic.version = 11 : i64} {
  func.func @_linear_kernel(%arg0: memref<64x32xf32, #tpu.memory_space<vmem>>, %arg1: memref<32x128xf32, #tpu.memory_space<vmem>>, %arg2: memref<64x128xf32, #tpu.memory_space<vmem>>) attributes {dimension_semantics = [], scalar_prefetch = 0 : i64, scratch_operands = 0 : i64, tpu.core_type = #tpu.core_type<tc>} {
    %c0 = arith.constant 0 : index
    %c0_0 = arith.constant 0 : index
    %0 = vector.load %arg0[%c0, %c0_0] : memref<64x32xf32, #tpu.memory_space<vmem>>, vector<64x32xf32>
    %c0_1 = arith.constant 0 : index
    %c0_2 = arith.constant 0 : index
    %1 = vector.load %arg1[%c0_1, %c0_2] : memref<32x128xf32, #tpu.memory_space<vmem>>, vector<32x128xf32>
    %cst = arith.constant dense<0.000000e+00> : vector<64x128xf32>
    %2 = tpu.matmul %0, %1, %cst {dimension_numbers = #tpu.dot_dimension_numbers<[1], [0], [0], [1], [0, 0, 1, 1], [], []>} : vector<64x32xf32>, vector<32x128xf32>, vector<64x128xf32> -> vector<64x128xf32>
    %c0_3 = arith.constant 0 : index
    %c0_4 = arith.constant 0 : index
    %3 = vector.load %arg2[%c0_3, %c0_4] : memref<64x128xf32, #tpu.memory_space<vmem>>, vector<64x128xf32>
    tpu.vector_store %arg2[%c0_3, %c0_4], %2 {strides = array<i32>} : memref<64x128xf32, #tpu.memory_space<vmem>>, vector<64x128xf32>,
    return
  }
}

</mosaic_0001>

<bundles_post_ra>
// kernel: tpu_custom_call.1
= control target key start
LH: loop header
LB: loop body
LE: loop exit
PB: predicated region body
PF: predicated region fallthrough
CT: control target
= control target key end

     0   :  { %s316_s0 = inlined_call_operand.vmem [shape: f32[64,32], index: 0, kind: input, shape index: {}]   ;;  %s317_s1 = inlined_call_operand.vmem [shape: f32[32,128], index: 1, kind: input, shape index: {}]   ;;  %s318_s2 = inlined_call_operand.hbm [shape: f32[64,128], index: 2, kind: output, shape index: {}]  }
   0x1   :  { %v23_v0 = vld [vmem:[%s317_s1 + $0x18] sm:$0xff]  ;;  %v22_v1 = vld [vmem:[%s317_s1 + $0x10] sm:$0xff]  ;;  %v21_v2 = vld [vmem:[%s317_s1 + $0x8] sm:$0xff] }
   0x2   :  { %198 = vmatprep.subr.mxu0 %v23_v0  ;;  %218 = vmatprep.subr.mxu1 %v23_v0  ;;  %v20_v3 = vld [vmem:[%s317_s1] sm:$0xff] }
   0x3   :  { %199 = vmatpush3.msra.mxu0 %v23_v0  ;;  %222 = vmatpush3.msra.mxu1 %v23_v0 }
   0x4   :  { %200 = vmatprep.subr.mxu0 %v22_v1  ;;  %219 = vmatprep.subr.mxu1 %v22_v1 }
   0x5   :  { %201 = vmatpush3.msra.mxu0 %v22_v1  ;;  %223 = vmatpush3.msra.mxu1 %v22_v1 }
   0x6   :  { %7 = vsyncpa [#allocation3], 0  ;;  %202 = vmatprep.subr.mxu0 %v21_v2  ;;  %220 = vmatprep.subr.mxu1 %v21_v2  ;;  %v12_v4 = vld [vmem:[%s316_s0] sm:$0xff]  ;;  %vm24_vm0 = vcmask 261120   ;;  %v13_v6 = vld [vmem:[%s316_s0 + $0x8] sm:$0xff]  ;;  %s251_s4 = smov [#allocation2]  }
   0x7   :  { %203 = vmatpush3.msra.mxu0 %v21_v2  ;;  %224 = vmatpush3.msra.mxu1 %v21_v2  ;;  %v16_v5 = vld [vmem:[%s316_s0 + $0x20] sm:$0xff]  ;;  %v17_v7 = vld [vmem:[%s316_s0 + $0x28] sm:$0xff]  ;;  %v14_v8 = vld [vmem:[%s316_s0 + $0x10] sm:$0xff]  ;;  %s167_s5 = sshll.u32 %s251_s4, 4  ;;  %s168_s5 = int_to_ptr.vmem [resolvable:$true] %s167_s5 }
   0x8   :  { %204 = vmatprep.subr.mxu0 %v20_v3  ;;  %221 = vmatprep.subr.mxu1 %v20_v3  ;;  %v18_v9 = vld [vmem:[%s316_s0 + $0x30] sm:$0xff]  ;;  %v15_v10 = vld [vmem:[%s316_s0 + $0x18] sm:$0xff]  ;;  %p234_p1 = scmp.lt.s32.totalorder %s168_s5, %s168_s5 }
   0x9   :  { %205 = vmatpush3.msra.mxu0 %v20_v3  ;;  %225 = vmatpush3.msra.mxu1 %v20_v3  ;;  %v19_v11 = vld [vmem:[%s316_s0 + $0x38] sm:$0xff]  ;;  %s229_s0 = scalar_lea.vmem %s168_s5, 1024 }
   0xa   :  { %206 = vmatprep.mubr.msk.f32.mxu0 %vm24_vm0, %v12_v4  ;;  %212 = vmatprep.mubr.msk.f32.mxu1 %vm24_vm0, %v16_v5  ;;  %p230_p0 = scmp.ne.s32.totalorder %s168_s5, %s229_s0  ;;  %p235_p2 = scmp.lt.s32.totalorder %s229_s0, %s229_s0 }
   0xb   :  { %207 = vmatmul.mubr.msk.f32.vlgmr.msra.gmra.mxu0 %vm24_vm0, %v13_v6  ;;  %213 = vmatmul.mubr.msk.f32.vlgmr.msra.gmra.mxu1 %vm24_vm0, %v17_v7 }
   0xc   :  { %209 = vmatprep.mubr.msk.f32.mxu0 %vm24_vm0, %v14_v8  ;;  %215 = vmatprep.mubr.msk.f32.mxu1 %vm24_vm0, %v18_v9  ;;  %p236_p3 = por %p235_p2, %p234_p1 }
   0xe   :  { %p237_p4 = pnand %p236_p3, %p230_p0 }
   0xf   :  { %210 = vmatmul.mubr.msk.f32.gmra.mxu0 %vm24_vm0, %v15_v10  ;;  %216 = vmatmul.mubr.msk.f32.gmra.mxu1 %vm24_vm0, %v19_v11 }
  0xcb   :  { %v208_v12 = vpop.f32.mrf.mxu0  ;;  %v214_v13 = vpop.f32.mrf.mxu1 }
  0xcc   :  { %155 = vst [vmem:[#allocation2 + $0x8] sm:$0xff] %v208_v12  ;;  %159 = vst [vmem:[#allocation2 + $0x28] sm:$0xff] %v214_v13 }
  0xcd   :  { %v115_v14 = vpop.f32.mrf.mxu0  ;;  %v135_v15 = vpop.f32.mrf.mxu1 }
  0xce   :  { %154 = vst [vmem:[#allocation2] sm:$0xff] %v115_v14  ;;  %158 = vst [vmem:[#allocation2 + $0x20] sm:$0xff] %v135_v15 }
  0xcf   :  { %v211_v16 = vpop.f32.mrf.mxu0  ;;  %v217_v17 = vpop.f32.mrf.mxu1 }
  0xd0   :  { %157 = vst [vmem:[#allocation2 + $0x18] sm:$0xff] %v211_v16  ;;  %161 = vst [vmem:[#allocation2 + $0x38] sm:$0xff] %v217_v17 }
  0xd1   :  { %v125_v18 = vpop.f32.mrf.mxu0  ;;  %v145_v19 = vpop.f32.mrf.mxu1 }
  0xd2   :  { %156 = vst [vmem:[#allocation2 + $0x10] sm:$0xff] %v125_v18  ;;  %160 = vst [vmem:[#allocation2 + $0x30] sm:$0xff] %v145_v19 }
  0xd3   :  { %240 = shalt.err (!%p237_p4)
}
  0xd4   :  { %s252_s6 = smov 128   ;;  %s253_s7 = smov 8  }
  0xd5   :  { %173 = dma.vmem_to_hbm [thread:$0]  %s168_s5, 1024, %s318_s2, [#allocation3], %s252_s6, %s252_s6, %s253_s7  }
  0xd6   :  { %249 = dma.done.wait [#allocation3], 1024  }
  0xd7   :  { %250 = vsyncadd [#allocation3], 4294966272 }
  0xd8   :  { %177 = vsyncpa [#allocation3], 1 }

</bundles_post_ra>
